<compile_context>
chip_gen: v7x
topology: tpu7x:2x2x1
jax: 0.10.0
libtpu: 0.0.40
codegen_flags: <defaults>
</compile_context>

<pallas_src>
import functools

import jax
import jax.numpy as jnp
from jax import lax
from jax.experimental import pallas as pl
from jax.experimental.pallas import tpu as pltpu

BN_EPS = 1e-5
_LANE = 128
_SUBLANE = 8


def _round_up(x, m):
    return (x + m - 1) // m * m


# --------------------------------------------------------------------------
# Pass 1: accumulate batch statistics of h = x @ w1t (per-core partials)
# --------------------------------------------------------------------------
def _stats_kernel(x_ref, w1t_ref, stats_ref, *, true_b, tb):
    c = pl.program_id(0)
    i = pl.program_id(1)

    @pl.when(i == 0)
    def _():
        stats_ref[...] = jnp.zeros_like(stats_ref)

    # Global row offset of this tile (derived from program ids, NOT from the
    # clamped index_map), so rows >= true_b are always masked out even when
    # the tile is partially / fully out of range.
    row0 = (c * pl.num_programs(1) + i) * tb

    x = x_ref[...].astype(w1t_ref.dtype)
    h = jnp.dot(x, w1t_ref[...], preferred_element_type=jnp.float32)
    rows = lax.broadcasted_iota(jnp.int32, (tb, 1), 0) + row0
    h = jnp.where(rows < true_b, h, 0.0)

    stats_ref[0:1, :] += jnp.sum(h, axis=0, keepdims=True)      # sum(h)
    stats_ref[1:2, :] += jnp.sum(h * h, axis=0, keepdims=True)  # sum(h^2)


# --------------------------------------------------------------------------
# Pass 2: h = relu((x @ w1t) * scale + shift) ; o = h @ w2t
# --------------------------------------------------------------------------
def _proj_kernel(x_ref, w1t_ref, scale_ref, shift_ref, w2t_ref, o_ref):
    x = x_ref[...].astype(w1t_ref.dtype)
    h = jnp.dot(x, w1t_ref[...], preferred_element_type=jnp.float32)
    h = jnp.maximum(h * scale_ref[...] + shift_ref[...], 0.0)   # fused BN affine + ReLU
    o_ref[...] = jnp.dot(
        h.astype(w2t_ref.dtype), w2t_ref[...], preferred_element_type=jnp.float32
    ).astype(o_ref.dtype)


# --------------------------------------------------------------------------
# One-time parameter preparation (at parameter creation, NOT per call):
# pad feature dims to lane multiples, pre-transpose, cast to compute dtype.
# --------------------------------------------------------------------------
def prepare_params(w1, gamma, beta, w2, *, compute_dtype=jnp.bfloat16):
    """w1: [H, H] (torch [out,in]); w2: [D, H]; gamma/beta: [H]."""
    H = w1.shape[0]
    D = w2.shape[0]
    Hp = _round_up(H, _LANE)
    Dp = _round_up(D, _LANE)

    w1t = jnp.pad(jnp.transpose(w1), ((0, Hp - H), (0, Hp - H))).astype(compute_dtype)
    w2t = jnp.pad(jnp.transpose(w2), ((0, Hp - H), (0, Dp - D))).astype(compute_dtype)
    gamma_p = jnp.pad(gamma.astype(jnp.float32), (0, Hp - H))   # [Hp]
    beta_p = jnp.pad(beta.astype(jnp.float32), (0, Hp - H))     # [Hp]
    return {"w1t": w1t, "w2t": w2t, "gamma": gamma_p, "beta": beta_p, "H": H, "D": D}


def _vmem_bytes(tb, Hp, Dp, x_item, w_item, out_item):
    return int(
        2 * tb * Hp * x_item       # double-buffered x tiles
        + Hp * Hp * w_item         # w1t (single-buffered, resident)
        + Hp * Dp * w_item         # w2t (single-buffered, resident)
        + 4 * Hp * 4               # scale / shift vectors
        + 2 * tb * Dp * out_item   # double-buffered output tiles
        + 3 * tb * Hp * 4          # f32 h / h*h / bf16-cast intermediates
        + (4 << 20)                # Mosaic internal scratch headroom
    )


@functools.partial(jax.jit, static_argnums=(5, 6, 7))
def _projection_head_impl(x, w1t, gamma, beta, w2t, H, D, batch_tile):
    B = x.shape[0]
    Hp = w1t.shape[0]
    Dp = w2t.shape[1]
    x_item = x.dtype.itemsize
    w_item = jnp.dtype(w1t.dtype).itemsize
    out_item = x_item

    # Per-generation VMEM budget: 128 MiB parts (v5e/v6e) -> ~100 MiB,
    # v7x (64 MiB physical) -> ~51 MiB; conservative fallback if query fails.
    try:
        phys_vmem = int(getattr(pltpu.get_tpu_info(), "vmem_capacity_bytes", 64 << 20))
    except Exception:  # pragma: no cover - defensive
        phys_vmem = 64 << 20
    vmem_cap = min((phys_vmem * 4) // 5, 100 << 20)

    # Batch tile: large (streaming-bound -> bigger is better), rounded to the
    # dtype-packed sublane multiple, shrunk until the footprint fits.
    sub = max(_SUBLANE, 32 // x_item)
    TB = max(sub, min(_round_up(batch_tile, sub), _round_up(B, sub)))
    while TB > sub and _vmem_bytes(TB, Hp, Dp, x_item, w_item, out_item) > vmem_cap:
        TB = max(sub, _round_up(TB // 2, sub))
    nB = pl.cdiv(B, TB)
    vmem_limit = int(
        min(max(_vmem_bytes(TB, Hp, Dp, x_item, w_item, out_item), 32 << 20), vmem_cap)
    )

    # Feature padding only when H is not lane-aligned; the batch is never padded.
    xp = x if H == Hp else jnp.pad(x, ((0, 0), (0, Hp - H)))

    # Split pass-1 batch tiles across (up to) two cores; each gets its own
    # [2, Hp] partial accumulator.  Overhang tiles are clamped in the
    # index_map and fully masked in-kernel.
    n_split = 2 if nB >= 2 else 1
    n_half = pl.cdiv(nB, n_split)

    def inv_spec(shape):
        nd = len(shape)
        return pl.BlockSpec(shape, lambda *idx: (0,) * nd,
                            pipeline_mode=pl.Buffered(1))

    x_bytes = xp.size * x_item
    w1_bytes = w1t.size * w_item
    w2_bytes = w2t.size * w_item

    # ---- pass 1: batch statistics (reduction over the batch grid axis) ----
    partials = pl.pallas_call(
        functools.partial(_stats_kernel, true_b=B, tb=TB),
        out_shape=jax.ShapeDtypeStruct((n_split, 2, Hp), jnp.float32),
        grid=(n_split, n_half),
        in_specs=[
            pl.BlockSpec((TB, Hp),
                         lambda c, i: (jnp.minimum(c * n_half + i, nB - 1), 0)),
            inv_spec((Hp, Hp)),                          # w1t resident, single-buffered
        ],
        out_specs=pl.BlockSpec((None, 2, Hp), lambda c, i: (c, 0, 0)),
        compiler_params=pltpu.CompilerParams(
            dimension_semantics=("parallel", "arbitrary"),
            vmem_limit_bytes=vmem_limit,
        ),
        cost_estimate=pl.CostEstimate(
            flops=2 * B * Hp * Hp,
            transcendentals=0,
            bytes_accessed=x_bytes + w1_bytes + n_split * 2 * Hp * 4,
        ),
    )(xp, w1t)

    # Fold training-mode BN (biased variance) into a single scale/shift [1, Hp].
    stats = jnp.sum(partials, axis=0)
    mean = stats[0] / B
    var = jnp.maximum(stats[1] / B - mean * mean, 0.0)
    scale = gamma * lax.rsqrt(var + BN_EPS)
    shift = beta - mean * scale
    scale2 = scale.reshape(1, Hp)
    shift2 = shift.reshape(1, Hp)

    # ---- pass 2: normalize + ReLU + second projection (batch-parallel) ----
    out = pl.pallas_call(
        _proj_kernel,
        out_shape=jax.ShapeDtypeStruct((B, Dp), x.dtype),
        grid=(nB,),
        in_specs=[
            pl.BlockSpec((TB, Hp), lambda i: (i, 0)),    # x tile streams
            inv_spec((Hp, Hp)),                          # w1t resident
            inv_spec((1, Hp)),                           # scale resident
            inv_spec((1, Hp)),                           # shift resident
            inv_spec((Hp, Dp)),                          # w2t resident
        ],
        out_specs=pl.BlockSpec((TB, Dp), lambda i: (i, 0)),  # lane-dense output tile
        compiler_params=pltpu.CompilerParams(
            dimension_semantics=("parallel",),
            vmem_limit_bytes=vmem_limit,
        ),
        cost_estimate=pl.CostEstimate(
            flops=2 * B * Hp * Hp + 2 * B * Hp * Dp,
            transcendentals=0,
            bytes_accessed=x_bytes + w1_bytes + w2_bytes + B * Dp * out_item,
        ),
    )(xp, w1t, scale2, shift2, w2t)

    return out if Dp == D else out[:, :D]


def projection_head(x, params, *, batch_tile=512):
    """x: [B, H]; params from prepare_params(); returns [B, D] in x.dtype."""
    return _projection_head_impl(
        x, params["w1t"], params["gamma"], params["beta"], params["w2t"],
        params["H"], params["D"], batch_tile,
    )


def _reference(x, w1, gamma, beta, w2):
    # pure-JAX reference (PyTorch training-mode BatchNorm1d: biased variance)
    h = x @ w1.T
    mean = h.mean(axis=0, keepdims=True)
    var = ((h - mean) ** 2).mean(axis=0, keepdims=True)
    h = (h - mean) / jnp.sqrt(var + BN_EPS)
    h = h * gamma[None, :] + beta[None, :]
    h = jnp.maximum(h, 0.0)
    return h @ w2.T


if __name__ == "__main__":
    # small shapes consistent with the module: batch=8, hidden=32, d=16
    B, H, D = 8, 32, 16

    key = jax.random.PRNGKey(0)
    kx, kw1, kw2 = jax.random.split(key, 3)

    x = jax.random.normal(kx, (B, H), dtype=jnp.float32)
    # Linear weights are [out_features, in_features] (torch layout)
    w1 = jax.random.normal(kw1, (H, H), dtype=jnp.float32) * 0.1
    w2 = jax.random.normal(kw2, (D, H), dtype=jnp.float32) * 0.1
    gamma = jnp.ones((H,), dtype=jnp.float32)   # BatchNorm1d weight
    beta = jnp.zeros((H,), dtype=jnp.float32)   # BatchNorm1d bias

    params = prepare_params(w1, gamma, beta, w2)   # one-time prep (pad + transpose + bf16)

    out = projection_head(x, params)
    out = jax.block_until_ready(out)

    ref = _reference(x, w1, gamma, beta, w2)
    assert out.shape == (B, D)
    # bf16 MXU compute with f32 accumulation -> compare at bf16-level tolerance
    assert jnp.allclose(out, ref, atol=5e-2, rtol=5e-2), "mismatch vs reference"

    print("KERNEL_OK")
</pallas_src>

<mosaic_0001>
module attributes {stable_mosaic.version = 11 : i64} {
  func.func @_proj_kernel(%arg0: i32, %arg1: memref<8x128xf32, #tpu.memory_space<vmem>>, %arg2: memref<128x128xbf16, #tpu.memory_space<vmem>>, %arg3: memref<1x128xf32, #tpu.memory_space<vmem>>, %arg4: memref<1x128xf32, #tpu.memory_space<vmem>>, %arg5: memref<128x128xbf16, #tpu.memory_space<vmem>>, %arg6: memref<8x128xf32, #tpu.memory_space<vmem>>) attributes {dimension_semantics = [#tpu.dimension_semantics<parallel>], iteration_bounds = array<i64: 1>, scalar_prefetch = 0 : i64, scratch_operands = 0 : i64, tpu.core_type = #tpu.core_type<tc>, window_params = [{transform_indices = @transform_0, window_bounds = array<i64: 8, 128>}, {pipeline_mode = #tpu.pipeline_mode<synchronous>, transform_indices = @transform_1, window_bounds = array<i64: 128, 128>}, {pipeline_mode = #tpu.pipeline_mode<synchronous>, transform_indices = @transform_2, window_bounds = array<i64: 1, 128>}, {pipeline_mode = #tpu.pipeline_mode<synchronous>, transform_indices = @transform_3, window_bounds = array<i64: 1, 128>}, {pipeline_mode = #tpu.pipeline_mode<synchronous>, transform_indices = @transform_4, window_bounds = array<i64: 128, 128>}, {transform_indices = @transform_5, window_bounds = array<i64: 8, 128>}]} {
    %c0 = arith.constant 0 : index
    %c0_0 = arith.constant 0 : index
    %0 = vector.load %arg1[%c0, %c0_0] : memref<8x128xf32, #tpu.memory_space<vmem>>, vector<8x128xf32>
    %1 = arith.truncf %0 : vector<8x128xf32> to vector<8x128xbf16>
    %c0_1 = arith.constant 0 : index
    %c0_2 = arith.constant 0 : index
    %2 = vector.load %arg2[%c0_1, %c0_2] : memref<128x128xbf16, #tpu.memory_space<vmem>>, vector<128x128xbf16>
    %cst = arith.constant dense<0.000000e+00> : vector<8x128xf32>
    %3 = tpu.matmul %1, %2, %cst {dimension_numbers = #tpu.dot_dimension_numbers<[1], [0], [0], [1], [0, 0, 1, 1], [], []>} : vector<8x128xbf16>, vector<128x128xbf16>, vector<8x128xf32> -> vector<8x128xf32>
    %c0_3 = arith.constant 0 : index
    %c0_4 = arith.constant 0 : index
    %4 = vector.load %arg3[%c0_3, %c0_4] : memref<1x128xf32, #tpu.memory_space<vmem>>, vector<1x128xf32>
    %5 = vector.broadcast %4 : vector<1x128xf32> to vector<8x128xf32>
    %6 = arith.mulf %3, %5 : vector<8x128xf32>
    %c0_5 = arith.constant 0 : index
    %c0_6 = arith.constant 0 : index
    %7 = vector.load %arg4[%c0_5, %c0_6] : memref<1x128xf32, #tpu.memory_space<vmem>>, vector<1x128xf32>
    %8 = vector.broadcast %7 : vector<1x128xf32> to vector<8x128xf32>
    %9 = arith.addf %6, %8 : vector<8x128xf32>
    %cst_7 = arith.constant 0.000000e+00 : f32
    %10 = vector.broadcast %cst_7 : f32 to vector<8x128xf32>
    %11 = arith.maximumf %9, %10 : vector<8x128xf32>
    %12 = arith.truncf %11 : vector<8x128xf32> to vector<8x128xbf16>
    %c0_8 = arith.constant 0 : index
    %c0_9 = arith.constant 0 : index
    %13 = vector.load %arg5[%c0_8, %c0_9] : memref<128x128xbf16, #tpu.memory_space<vmem>>, vector<128x128xbf16>
    %cst_10 = arith.constant dense<0.000000e+00> : vector<8x128xf32>
    %14 = tpu.matmul %12, %13, %cst_10 {dimension_numbers = #tpu.dot_dimension_numbers<[1], [0], [0], [1], [0, 0, 1, 1], [], []>} : vector<8x128xbf16>, vector<128x128xbf16>, vector<8x128xf32> -> vector<8x128xf32>
    %c0_11 = arith.constant 0 : index
    %c0_12 = arith.constant 0 : index
    %15 = vector.load %arg6[%c0_11, %c0_12] : memref<8x128xf32, #tpu.memory_space<vmem>>, vector<8x128xf32>
    tpu.vector_store %arg6[%c0_11, %c0_12], %14 {strides = array<i32>} : memref<8x128xf32, #tpu.memory_space<vmem>>, vector<8x128xf32>,
    return
  }
  func.func @transform_0(%arg0: i32) -> (i32, i32) {
    %c0_i32 = arith.constant 0 : i32
    %c0_i32_0 = arith.constant 0 : i32
    return %arg0, %c0_i32 : i32, i32
  }
  func.func @transform_1(%arg0: i32) -> (i32, i32) {
    %c0_i32 = arith.constant 0 : i32
    %c0_i32_0 = arith.constant 0 : i32
    %c0_i32_1 = arith.constant 0 : i32
    return %c0_i32, %c0_i32_0 : i32, i32
  }
  func.func @transform_2(%arg0: i32) -> (i32, i32) {
    %c0_i32 = arith.constant 0 : i32
    %c0_i32_0 = arith.constant 0 : i32
    %c0_i32_1 = arith.constant 0 : i32
    return %c0_i32, %c0_i32_0 : i32, i32
  }
  func.func @transform_3(%arg0: i32) -> (i32, i32) {
    %c0_i32 = arith.constant 0 : i32
    %c0_i32_0 = arith.constant 0 : i32
    %c0_i32_1 = arith.constant 0 : i32
    return %c0_i32, %c0_i32_0 : i32, i32
  }
  func.func @transform_4(%arg0: i32) -> (i32, i32) {
    %c0_i32 = arith.constant 0 : i32
    %c0_i32_0 = arith.constant 0 : i32
    %c0_i32_1 = arith.constant 0 : i32
    return %c0_i32, %c0_i32_0 : i32, i32
  }
  func.func @transform_5(%arg0: i32) -> (i32, i32) {
    %c0_i32 = arith.constant 0 : i32
    %c0_i32_0 = arith.constant 0 : i32
    return %arg0, %c0_i32 : i32, i32
  }
}

module attributes {stable_mosaic.version = 11 : i64} {
  func.func @_stats_kernel(%arg0: i32, %arg1: i32, %arg2: memref<8x128xf32, #tpu.memory_space<vmem>>, %arg3: memref<128x128xbf16, #tpu.memory_space<vmem>>, %arg4: memref<1x2x128xf32, #tpu.memory_space<vmem>>) attributes {dimension_semantics = [#tpu.dimension_semantics<parallel>, #tpu.dimension_semantics<arbitrary>], iteration_bounds = array<i64: 1, 1>, scalar_prefetch = 0 : i64, scratch_operands = 0 : i64, tpu.core_type = #tpu.core_type<tc>, window_params = [{transform_indices = @transform_0, window_bounds = array<i64: 8, 128>}, {pipeline_mode = #tpu.pipeline_mode<synchronous>, transform_indices = @transform_1, window_bounds = array<i64: 128, 128>}, {transform_indices = @transform_2, window_bounds = array<i64: 1, 2, 128>}]} {
    %c0_i32 = arith.constant 0 : i32
    %0 = arith.cmpi eq, %arg1, %c0_i32 : i32
    %1 = arith.extui %0 : i1 to i32
    %c0_i32_0 = arith.constant 0 : i32
    %2 = arith.cmpi ne, %1, %c0_i32_0 : i32
    scf.if %2 {
      %cst_19 = arith.constant 0.000000e+00 : f32
      %36 = vector.broadcast %cst_19 : f32 to vector<2x128xf32>
      %c0_20 = arith.constant 0 : index
      %c0_21 = arith.constant 0 : index
      %c0_22 = arith.constant 0 : index
      %37 = vector.load %arg4[%c0_20, %c0_21, %c0_22] : memref<1x2x128xf32, #tpu.memory_space<vmem>>, vector<1x2x128xf32>
      %38 = vector.shape_cast %37 : vector<1x2x128xf32> to vector<2x128xf32>
      %39 = vector.shape_cast %36 : vector<2x128xf32> to vector<1x2x128xf32>
      tpu.vector_store %arg4[%c0_20, %c0_21, %c0_22], %39 {strides = array<i32>} : memref<1x2x128xf32, #tpu.memory_space<vmem>>, vector<1x2x128xf32>,
    } else {
    }
    %c1_i32 = arith.constant 1 : i32
    %3 = arith.muli %arg0, %c1_i32 : i32
    %4 = arith.addi %3, %arg1 : i32
    %c8_i32 = arith.constant 8 : i32
    %5 = arith.muli %4, %c8_i32 : i32
    %c0 = arith.constant 0 : index
    %c0_1 = arith.constant 0 : index
    %6 = vector.load %arg2[%c0, %c0_1] : memref<8x128xf32, #tpu.memory_space<vmem>>, vector<8x128xf32>
    %7 = arith.truncf %6 : vector<8x128xf32> to vector<8x128xbf16>
    %c0_2 = arith.constant 0 : index
    %c0_3 = arith.constant 0 : index
    %8 = vector.load %arg3[%c0_2, %c0_3] : memref<128x128xbf16, #tpu.memory_space<vmem>>, vector<128x128xbf16>
    %cst = arith.constant dense<0.000000e+00> : vector<8x128xf32>
    %9 = tpu.matmul %7, %8, %cst {dimension_numbers = #tpu.dot_dimension_numbers<[1], [0], [0], [1], [0, 0, 1, 1], [], []>} : vector<8x128xbf16>, vector<128x128xbf16>, vector<8x128xf32> -> vector<8x128xf32>
    %10 = tpu.iota {dimensions = array<i32: 0>} : vector<8x1xi32>
    %11 = vector.broadcast %5 : i32 to vector<8x1xi32>
    %12 = arith.addi %10, %11 : vector<8x1xi32>
    %c8_i32_4 = arith.constant 8 : i32
    %13 = vector.broadcast %c8_i32_4 : i32 to vector<8x1xi32>
    %14 = arith.cmpi slt, %12, %13 : vector<8x1xi32>
    %cst_5 = arith.constant 0.000000e+00 : f32
    %15 = vector.shape_cast %14 : vector<8x1xi1> to vector<8x1xi1>
    %16 = vector.broadcast %15 : vector<8x1xi1> to vector<8x128xi1>
    %17 = vector.broadcast %cst_5 : f32 to vector<8x128xf32>
    %18 = arith.select %16, %9, %17 : vector<8x128xi1>, vector<8x128xf32>
    %c0_6 = arith.constant 0 : index
    %c0_7 = arith.constant 0 : index
    %c0_8 = arith.constant 0 : index
    %19 = vector.load %arg4[%c0_6, %c0_7, %c0_8] : memref<1x2x128xf32, #tpu.memory_space<vmem>>, vector<1x1x128xf32>
    %20 = vector.shape_cast %19 : vector<1x1x128xf32> to vector<1x128xf32>
    %cst_9 = arith.constant dense<0.000000e+00> : vector<128xf32>
    %21 = vector.multi_reduction <add>, %18, %cst_9 [0] : vector<8x128xf32> to vector<128xf32>
    %22 = vector.shape_cast %21 : vector<128xf32> to vector<1x128xf32>
    %23 = arith.addf %20, %22 : vector<1x128xf32>
    %c0_10 = arith.constant 0 : index
    %c0_11 = arith.constant 0 : index
    %c0_12 = arith.constant 0 : index
    %24 = vector.load %arg4[%c0_10, %c0_11, %c0_12] : memref<1x2x128xf32, #tpu.memory_space<vmem>>, vector<1x1x128xf32>
    %25 = vector.shape_cast %24 : vector<1x1x128xf32> to vector<1x128xf32>
    %26 = vector.shape_cast %23 : vector<1x128xf32> to vector<1x1x128xf32>
    tpu.vector_store %arg4[%c0_10, %c0_11, %c0_12], %26 {strides = array<i32>} : memref<1x2x128xf32, #tpu.memory_space<vmem>>, vector<1x1x128xf32>,
    %c0_13 = arith.constant 0 : index
    %c1 = arith.constant 1 : index
    %c0_14 = arith.constant 0 : index
    %27 = vector.load %arg4[%c0_13, %c1, %c0_14] : memref<1x2x128xf32, #tpu.memory_space<vmem>>, vector<1x1x128xf32>
    %28 = vector.shape_cast %27 : vector<1x1x128xf32> to vector<1x128xf32>
    %29 = arith.mulf %18, %18 : vector<8x128xf32>
    %cst_15 = arith.constant dense<0.000000e+00> : vector<128xf32>
    %30 = vector.multi_reduction <add>, %29, %cst_15 [0] : vector<8x128xf32> to vector<128xf32>
    %31 = vector.shape_cast %30 : vector<128xf32> to vector<1x128xf32>
    %32 = arith.addf %28, %31 : vector<1x128xf32>
    %c0_16 = arith.constant 0 : index
    %c1_17 = arith.constant 1 : index
    %c0_18 = arith.constant 0 : index
    %33 = vector.load %arg4[%c0_16, %c1_17, %c0_18] : memref<1x2x128xf32, #tpu.memory_space<vmem>>, vector<1x1x128xf32>
    %34 = vector.shape_cast %33 : vector<1x1x128xf32> to vector<1x128xf32>
    %35 = vector.shape_cast %32 : vector<1x128xf32> to vector<1x1x128xf32>
    tpu.vector_store %arg4[%c0_16, %c1_17, %c0_18], %35 {strides = array<i32>} : memref<1x2x128xf32, #tpu.memory_space<vmem>>, vector<1x1x128xf32>,
    return
  }
  func.func @transform_0(%arg0: i32, %arg1: i32) -> (i32, i32) {
    %c1_i32 = arith.constant 1 : i32
    %0 = arith.muli %arg0, %c1_i32 : i32
    %1 = arith.addi %0, %arg1 : i32
    %c0_i32 = arith.constant 0 : i32
    %2 = arith.minsi %1, %c0_i32 : i32
    %c0_i32_0 = arith.constant 0 : i32
    %c0_i32_1 = arith.constant 0 : i32
    return %2, %c0_i32_0 : i32, i32
  }
  func.func @transform_1(%arg0: i32, %arg1: i32) -> (i32, i32) {
    %c0_i32 = arith.constant 0 : i32
    %c0_i32_0 = arith.constant 0 : i32
    %c0_i32_1 = arith.constant 0 : i32
    return %c0_i32, %c0_i32_0 : i32, i32
  }
  func.func @transform_2(%arg0: i32, %arg1: i32) -> (i32, i32, i32) {
    %c0_i32 = arith.constant 0 : i32
    %c0_i32_0 = arith.constant 0 : i32
    %c0_i32_1 = arith.constant 0 : i32
    return %arg0, %c0_i32, %c0_i32_0 : i32, i32, i32
  }
}

</mosaic_0001>

<bundles_post_ra>
// kernel: _projection_head_impl.3
= control target key start
LH: loop header
LB: loop body
LE: loop exit
PB: predicated region body
PF: predicated region fallthrough
CT: control target
= control target key end

     0   :  { %10 = vsyncpa [#allocation3], 0  ;;  %s519_s0 = inlined_call_operand.vmem [shape: f32[8,128], index: 0, kind: input, shape index: {}]   ;;  %s520_s1 = inlined_call_operand.vmem [shape: bf16[128,128], index: 1, kind: input, shape index: {}]   ;;  %s521_s2 = inlined_call_operand.vmem [shape: f32[1,128], index: 2, kind: input, shape index: {}]   ;;  %s522_s3 = inlined_call_operand.vmem [shape: f32[1,128], index: 3, kind: input, shape index: {}]   ;;  %s523_s4 = inlined_call_operand.hbm [shape: bf16[128,128], index: 4, kind: input, shape index: {}]   ;;  %s524_s5 = inlined_call_operand.hbm [shape: f32[8,128], index: 5, kind: output, shape index: {}]  }
   0x1   :  { %11 = vsyncpa [#allocation4], 0  ;;  %s426_s18 = smov [#allocation2]   ;;  %s378_s22 = scalar_lea.hbm %s523_s4, 1024 }
   0x2   :  { %s25_s19 = sshll.u32 %s426_s18, 4  ;;  %p379_p0 = scmp.ne.s32.totalorder %s523_s4, %s378_s22  ;;  %s26_s19 = int_to_ptr.vmem [resolvable:$true] %s25_s19 }
   0x3   :  { %p382_p1 = scmp.lt.u32.totalorder %s378_s22, %s523_s4 }
   0x5   :  { %p384_p2 = pnand %p382_p1, %p379_p0 }
   0x7   :  { %387 = shalt.err (!%p384_p2)
}
   0x8   :  { %s388_s27 = scalar_lea.vmem %s26_s19, 1024  ;;  %p393_p4 = scmp.lt.s32.totalorder %s26_s19, %s26_s19 }
   0x9   :  { %p389_p3 = scmp.ne.s32.totalorder %s26_s19, %s388_s27  ;;  %p394_p5 = scmp.lt.s32.totalorder %s388_s27, %s388_s27 }
   0xb   :  { %p395_p6 = por %p394_p5, %p393_p4 }
   0xd   :  { %p396_p7 = pnand %p395_p6, %p389_p3 }
   0xf   :  { %399 = shalt.err (!%p396_p7)
}
  0x10   :  { %s427_s28 = smov 64   ;;  %s428_s29 = smov 4  }
  0x11   :  { %31 = dma.hbm_to_vmem [thread:$0]  %s523_s4, 1024, %s26_s19, [#allocation3], %s427_s28, %s427_s28, %s428_s29  }
  0x12   :  { %422 = dma.done.wait [#allocation3], 1024  }
  0x13   :  { %423 = vsyncadd [#allocation3], 4294966272  ;;  %v429_v0 = vmov 0.0   ;;  %vm430_vm0 = vmmov 0   ;;  %v362_v1 = vld [vmem:[%s520_s1] sm:$0xff]   ;;  %v363_v2 = vld [vmem:[%s520_s1 + $0x8] sm:$0xff]  }
  0x14   :  { %316 = vmatprep.subr.bf16.mxu0 %v429_v0  ;;  %332 = vmatprep.mubr.msk.bf16.mxu0 %vm430_vm0, %v429_v0  ;;  %v364_v3 = vld [vmem:[%s520_s1 + $0x10] sm:$0xff]   ;;  %v370_v4 = vld [vmem:[#allocation2] sm:$0xff]   ;;  %v365_v5 = vld [vmem:[%s520_s1 + $0x18] sm:$0xff]   ;;  %s431_s26 = smov [#allocation5]  }
  0x15   :  { %336 = vmatprep.subr.bf16.mxu1 %v429_v0  ;;  %352 = vmatprep.mubr.msk.bf16.mxu1 %vm430_vm0, %v429_v0  ;;  %v371_v6 = vld [vmem:[#allocation2 + $0x8] sm:$0xff]   ;;  %v366_v7 = vld [vmem:[%s520_s1 + $0x20] sm:$0xff]   ;;  %v372_v8 = vld [vmem:[#allocation2 + $0x10] sm:$0xff]   ;;  %s271_s27 = sshll.u32 %s431_s26, 4  ;;  %s272_s27 = int_to_ptr.vmem [resolvable:$true] %s271_s27 }
  0x16   :  { %317 = vmatpush3.bf16.msra.mxu0 %v362_v1  ;;  %337 = vmatpush3.bf16.msra.mxu1 %v370_v4  ;;  %v367_v9 = vld [vmem:[%s520_s1 + $0x28] sm:$0xff]   ;;  %v373_v10 = vld [vmem:[#allocation2 + $0x18] sm:$0xff]   ;;  %v368_v11 = vld [vmem:[%s520_s1 + $0x30] sm:$0xff]   ;;  %p405_p9 = scmp.lt.s32.totalorder %s272_s27, %s272_s27 }
  0x17   :  { %318 = vmatprep.subr.bf16.mxu0 %v429_v0  ;;  %338 = vmatprep.subr.bf16.mxu1 %v429_v0  ;;  %v374_v12 = vld [vmem:[#allocation2 + $0x20] sm:$0xff]   ;;  %v369_v13 = vld [vmem:[%s520_s1 + $0x38] sm:$0xff]   ;;  %v36_v14 = vld [vmem:[%s519_s0] sm:$0xff] }
  0x18   :  { %v375_v15 = vld [vmem:[#allocation2 + $0x28] sm:$0xff]   ;;  %v37_v16 = vpack.c.bf16 %v36_v14, %v36_v14  ;;  %v376_v17 = vld [vmem:[#allocation2 + $0x30] sm:$0xff]   ;;  %v377_v18 = vld [vmem:[#allocation2 + $0x38] sm:$0xff]  }
  0x19   :  { %v288_v19 = vld [vmem:[%s521_s2] ss:$0 sm:$0xff]  ;;  %s400_s2 = scalar_lea.vmem %s272_s27, 128 }
  0x1a   :  { %319 = vmatpush3.bf16.msra.mxu0 %v363_v2  ;;  %339 = vmatpush3.bf16.msra.mxu1 %v371_v6  ;;  %v289_v21 = vld [vmem:[%s522_s3] ss:$0 sm:$0xff]  ;;  %p401_p8 = scmp.ne.s32.totalorder %s272_s27, %s400_s2  ;;  %p406_p10 = scmp.lt.s32.totalorder %s400_s2, %s400_s2 }
  0x1b   :  { %320 = vmatprep.subr.bf16.mxu0 %v429_v0  ;;  %340 = vmatprep.subr.bf16.mxu1 %v429_v0 }
  0x1c   :  { %p407_p11 = por %p406_p10, %p405_p9 }
  0x1e   :  { %321 = vmatpush3.bf16.msra.mxu0 %v364_v3  ;;  %341 = vmatpush3.bf16.msra.mxu1 %v372_v8  ;;  %p408_p12 = pnand %p407_p11, %p401_p8 }
  0x1f   :  { %322 = vmatprep.subr.bf16.mxu0 %v429_v0  ;;  %342 = vmatprep.subr.bf16.mxu1 %v429_v0 }
  0x22   :  { %323 = vmatpush3.bf16.msra.mxu0 %v365_v5  ;;  %343 = vmatpush3.bf16.msra.mxu1 %v373_v10 }
  0x23   :  { %324 = vmatprep.subr.bf16.mxu0 %v429_v0  ;;  %344 = vmatprep.subr.bf16.mxu1 %v429_v0 }
  0x26   :  { %325 = vmatpush3.bf16.msra.mxu0 %v366_v7  ;;  %345 = vmatpush3.bf16.msra.mxu1 %v374_v12 }
  0x27   :  { %326 = vmatprep.subr.bf16.mxu0 %v429_v0  ;;  %346 = vmatprep.subr.bf16.mxu1 %v429_v0 }
  0x2a   :  { %327 = vmatpush3.bf16.msra.mxu0 %v367_v9  ;;  %347 = vmatpush3.bf16.msra.mxu1 %v375_v15 }
  0x2b   :  { %328 = vmatprep.subr.bf16.mxu0 %v429_v0  ;;  %348 = vmatprep.subr.bf16.mxu1 %v429_v0 }
  0x2e   :  { %329 = vmatpush3.bf16.msra.mxu0 %v368_v11  ;;  %349 = vmatpush3.bf16.msra.mxu1 %v376_v17 }
  0x2f   :  { %330 = vmatprep.subr.bf16.mxu0 %v429_v0  ;;  %350 = vmatprep.subr.bf16.mxu1 %v429_v0 }
  0x32   :  { %331 = vmatpush3.bf16.msra.mxu0 %v369_v13  ;;  %351 = vmatpush3.bf16.msra.mxu1 %v377_v18 }
  0x35   :  { %333 = vmatmul.mubr.bf16.vlgmr.msra.gmra.mrb[0].mxu0 %v37_v16 }
 0x108   :  { %v136_v20 = vpop.f32.mrb[0].mxu0 }
 0x109   :  { %v149_v22 = vmul.f32 %v288_v19, %v136_v20  ;;  %v334_v23 = vpop.f32.mrb[1].mxu0 }
 0x10a   :  { %v139_v24 = vpop.f32.mrb[2].mxu0 }
 0x10b   :  { %v157_v25 = vadd.f32 %v289_v21, %v149_v22  ;;  %v335_v26 = vpop.f32.mrb[3].mxu0 }
 0x10d   :  { %v158_v27 = vmax.f32 %v157_v25, 0.0 }
 0x10f   :  { %v159_v28 = vpack.c.bf16 %v158_v27, %v158_v27 }
 0x111   :  { %353 = vmatmul.mubr.bf16.vlgmr.msra.gmra.mrb[0].mxu1 %v159_v28 }
 0x1e4   :  { %v258_v29 = vpop.f32.mrb[0].mxu1 }
 0x1e5   :  { %264 = vst [vmem:[#allocation5] sm:$0xff] %v258_v29  ;;  %v354_v30 = vpop.f32.mrb[1].mxu1 }
 0x1e6   :  { %v261_v31 = vpop.f32.mrb[2].mxu1 }
 0x1e7   :  { %411 = shalt.err (!%p408_p12)
}
 0x1e8   :  { %s412_s29 = scalar_lea.hbm %s524_s5, 128 }
 0x1e9   :  { %p413_p13 = scmp.ne.s32.totalorder %s524_s5, %s412_s29  ;;  %p416_p0 = scmp.lt.u32.totalorder %s412_s29, %s524_s5 }
 0x1eb   :  { %p418_p1 = pnand %p416_p0, %p413_p13 }
 0x1ed   :  { %421 = shalt.err (!%p418_p1)
}
 0x1ee   :  { %274 = dma.vmem_to_hbm [thread:$0]  %s272_s27, 128, %s524_s5, [#allocation4]   ;;  %v355_v32 = vpop.f32.mrb[3].mxu1 }
 0x1ef   :  { %424 = dma.done.wait [#allocation4], 128  }
 0x1f0   :  { %425 = vsyncadd [#allocation4], 4294967168 }
 0x1f1   :  { %278 = vsyncpa [#allocation3], 1 }
 0x1f2   :  { %279 = vsyncpa [#allocation4], 1 }

// kernel: _projection_head_impl.2
= control target key start
LH: loop header
LB: loop body
LE: loop exit
PB: predicated region body
PF: predicated region fallthrough
CT: control target
= control target key end

     0   :  { %7 = vsyncpa [#allocation3], 0  ;;  %s278_s9 = smov [#allocation2]   ;;  %s328_s0 = inlined_call_operand.vmem [shape: f32[8,128], index: 0, kind: input, shape index: {}]   ;;  %s329_s1 = inlined_call_operand.hbm [shape: bf16[128,128], index: 1, kind: input, shape index: {}]   ;;  %s330_s2 = inlined_call_operand.vmem [shape: f32[1,2,128], index: 2, kind: output, shape index: {}]  }
   0x1   :  { %s25_s10 = sshll.u32 %s278_s9, 4  ;;  %s254_s13 = scalar_lea.hbm %s329_s1, 1024  ;;  %s26_s10 = int_to_ptr.vmem [resolvable:$true] %s25_s10 }
   0x2   :  { %p255_p0 = scmp.ne.s32.totalorder %s329_s1, %s254_s13  ;;  %p258_p1 = scmp.lt.u32.totalorder %s254_s13, %s329_s1 }
   0x4   :  { %p260_p2 = pnand %p258_p1, %p255_p0 }
   0x6   :  { %263 = shalt.err (!%p260_p2)
}
   0x7   :  { %s264_s18 = scalar_lea.vmem %s26_s10, 1024  ;;  %p269_p4 = scmp.lt.s32.totalorder %s26_s10, %s26_s10 }
   0x8   :  { %p265_p3 = scmp.ne.s32.totalorder %s26_s10, %s264_s18  ;;  %p270_p5 = scmp.lt.s32.totalorder %s264_s18, %s264_s18 }
   0xa   :  { %p271_p6 = por %p270_p5, %p269_p4 }
   0xc   :  { %p272_p7 = pnand %p271_p6, %p265_p3 }
   0xe   :  { %275 = shalt.err (!%p272_p7)
}
   0xf   :  { %s279_s19 = smov 64   ;;  %s280_s20 = smov 4  }
  0x10   :  { %31 = dma.hbm_to_vmem [thread:$0]  %s329_s1, 1024, %s26_s10, [#allocation3], %s279_s19, %s279_s19, %s280_s20  }
  0x11   :  { %276 = dma.done.wait [#allocation3], 1024  }
  0x12   :  { %277 = vsyncadd [#allocation3], 4294966272  ;;  %v281_v0 = vmov 0.0   ;;  %vm282_vm0 = vmmov 0   ;;  %v246_v1 = vld [vmem:[#allocation2] sm:$0xff]   ;;  %v247_v2 = vld [vmem:[#allocation2 + $0x8] sm:$0xff]  }
  0x13   :  { %221 = vmatprep.subr.bf16.mxu0 %v281_v0  ;;  %57 = vst [vmem:[%s330_s2] sm:$0x3] %v281_v0  ;;  %237 = vmatprep.mubr.msk.bf16.mxu0 %vm282_vm0, %v281_v0  ;;  %v248_v3 = vld [vmem:[#allocation2 + $0x10] sm:$0xff]   ;;  %v249_v4 = vld [vmem:[#allocation2 + $0x18] sm:$0xff]   ;;  %v250_v5 = vld [vmem:[#allocation2 + $0x20] sm:$0xff]  }
  0x14   :  { %222 = vmatpush3.bf16.msra.mxu0 %v246_v1  ;;  %v251_v6 = vld [vmem:[#allocation2 + $0x28] sm:$0xff]   ;;  %v252_v7 = vld [vmem:[#allocation2 + $0x30] sm:$0xff]   ;;  %v253_v8 = vld [vmem:[#allocation2 + $0x38] sm:$0xff]  }
  0x15   :  { %223 = vmatprep.subr.bf16.mxu0 %v281_v0  ;;  %v60_v9 = vld [vmem:[%s328_s0] sm:$0xff] }
  0x16   :  { %v61_v10 = vpack.c.bf16 %v60_v9, %v60_v9 }
  0x18   :  { %224 = vmatpush3.bf16.msra.mxu0 %v247_v2 }
  0x19   :  { %225 = vmatprep.subr.bf16.mxu0 %v281_v0 }
  0x1a   :  { %v174_v25 = vld [vmem:[%s330_s2] sm:$0x1]  ;;  %v183_v28 = vld [vmem:[%s330_s2 + $0x1] sm:$0x1] }
  0x1c   :  { %226 = vmatpush3.bf16.msra.mxu0 %v248_v3 }
  0x1d   :  { %227 = vmatprep.subr.bf16.mxu0 %v281_v0 }
  0x20   :  { %228 = vmatpush3.bf16.msra.mxu0 %v249_v4 }
  0x21   :  { %229 = vmatprep.subr.bf16.mxu0 %v281_v0 }
  0x24   :  { %230 = vmatpush3.bf16.msra.mxu0 %v250_v5 }
  0x25   :  { %231 = vmatprep.subr.bf16.mxu0 %v281_v0 }
  0x28   :  { %232 = vmatpush3.bf16.msra.mxu0 %v251_v6 }
  0x29   :  { %233 = vmatprep.subr.bf16.mxu0 %v281_v0 }
  0x2c   :  { %234 = vmatpush3.bf16.msra.mxu0 %v252_v7 }
  0x2d   :  { %235 = vmatprep.subr.bf16.mxu0 %v281_v0 }
  0x30   :  { %236 = vmatpush3.bf16.msra.mxu0 %v253_v8 }
  0x33   :  { %238 = vmatmul.mubr.bf16.vlgmr.msra.gmra.mrb[0].mxu0 %v61_v10 }
 0x106   :  { %v160_v11 = vpop.f32.mrb[0].mxu0 }
 0x107   :  { %v175_v12 = vrot.slane %v160_v11, 4  ;;  %v184_v13 = vmul.f32 %v160_v11, %v160_v11  ;;  %v239_v14 = vpop.f32.mrb[1].mxu0 }
 0x108   :  { %v163_v15 = vpop.f32.mrb[2].mxu0 }
 0x109   :  { %v176_v16 = vadd.f32 %v175_v12, %v160_v11  ;;  %v185_v17 = vrot.slane %v184_v13, 4  ;;  %v240_v18 = vpop.f32.mrb[3].mxu0 }
 0x10b   :  { %v177_v19 = vrot.slane %v176_v16, 2  ;;  %v186_v20 = vadd.f32 %v185_v17, %v184_v13 }
 0x10d   :  { %v178_v21 = vadd.f32 %v177_v19, %v176_v16  ;;  %v187_v22 = vrot.slane %v186_v20, 2 }
 0x10f   :  { %v179_v23 = vrot.slane %v178_v21, 1  ;;  %v188_v24 = vadd.f32 %v187_v22, %v186_v20 }
 0x111   :  { %v180_v26 = vadd.f32 %v179_v23, %v178_v21  ;;  %v189_v27 = vrot.slane %v188_v24, 1 }
 0x113   :  { %v181_v29 = vadd.f32 %v180_v26, %v174_v25  ;;  %v190_v30 = vadd.f32 %v189_v27, %v188_v24 }
 0x115   :  { %182 = vst [vmem:[%s330_s2] sm:$0x1] %v181_v29  ;;  %v191_v31 = vadd.f32 %v190_v30, %v183_v28 }
 0x117   :  { %192 = vst [vmem:[%s330_s2 + $0x1] sm:$0x1] %v191_v31 }
 0x118   :  { %197 = vsyncpa [#allocation3], 1 }

</bundles_post_ra>
